<compile_context>
chip_gen: v6e
topology: v6e:2x2x1
jax: 0.10.0
libtpu: 0.0.40
codegen_flags: <defaults>
</compile_context>

<pallas_src>
import functools

import jax
import jax.numpy as jnp
from jax.experimental import pallas as pl
from jax.experimental.pallas import tpu as pltpu


def _round_up(x, m):
    return ((x + m - 1) // m) * m


def _apply_activation(h, activation):
    if activation is None:
        return h
    if callable(activation):
        # Mirrors the torch module, which accepts an arbitrary activation fn.
        return activation(h)
    if activation == "tanh":
        return jnp.tanh(h)
    if activation == "relu":
        return jnp.maximum(h, 0.0)
    if activation == "sigmoid":
        # exp rides the EUP slot; approx reciprocal keeps the divide off VALU.
        return pl.reciprocal(1.0 + jnp.exp(-h), approx=True)
    raise ValueError(f"unsupported activation: {activation}")


def _nl_kernel_bias(x_ref, w_ref, b_ref, o_ref, acc_ref, *, activation):
    k = pl.program_id(2)

    @pl.when(k == 0)
    def _():
        acc_ref[...] = jnp.zeros_like(acc_ref)

    acc_ref[...] += jnp.dot(
        x_ref[...], w_ref[...], preferred_element_type=jnp.float32
    )

    @pl.when(k == pl.num_programs(2) - 1)
    def _():
        h = acc_ref[...] + b_ref[...]  # (1, tn) broadcasts over rows
        o_ref[...] = _apply_activation(h, activation).astype(o_ref.dtype)


def _nl_kernel_nobias(x_ref, w_ref, o_ref, acc_ref, *, activation):
    k = pl.program_id(2)

    @pl.when(k == 0)
    def _():
        acc_ref[...] = jnp.zeros_like(acc_ref)

    acc_ref[...] += jnp.dot(
        x_ref[...], w_ref[...], preferred_element_type=jnp.float32
    )

    @pl.when(k == pl.num_programs(2) - 1)
    def _():
        o_ref[...] = _apply_activation(acc_ref[...], activation).astype(o_ref.dtype)


def nonlinear(x, weight_t, bias=None, activation=None, *,
              tm=None, tn=None, tk=None, compute_dtype=None):
    """Pallas equivalent of NonLinear.forward.

    x:        [M, K]  activations.
    weight_t: [K, N]  weight stored PRE-TRANSPOSED (torch weight is weight_t.T),
                      so the kernel computes x @ weight_t + bias == nn.Linear(x).
    bias:     [N] or None.
    activation: None | "tanh" | "sigmoid" | "relu" | callable.
    compute_dtype: e.g. jnp.bfloat16 to run the MXU in bf16 (f32 accumulate).
    """
    M, K = x.shape
    K2, N = weight_t.shape
    assert K == K2, (K, K2)
    out_dtype = x.dtype

    if compute_dtype is not None:
        x = x.astype(compute_dtype)
        weight_t = weight_t.astype(compute_dtype)

    # Default tiles: lane/MXU aligned, large enough to pipeline, small enough
    # for double-buffering even on v7x's 64 MiB VMEM.
    tm = tm if tm is not None else min(256, _round_up(M, 8))
    tn = tn if tn is not None else min(512, _round_up(N, 128))
    tk = tk if tk is not None else min(512, _round_up(K, 128))

    # Pad each dim up to a whole number of tiles (zero padding leaves the
    # matmul unchanged); lane-dense Np also gives unmasked stores.
    Mp, Kp, Np = _round_up(M, tm), _round_up(K, tk), _round_up(N, tn)
    if (Mp, Kp) != (M, K):
        x = jnp.pad(x, ((0, Mp - M), (0, Kp - K)))
    if (Kp, Np) != (K, N):
        weight_t = jnp.pad(weight_t, ((0, Kp - K), (0, Np - N)))

    grid = (Mp // tm, Np // tn, Kp // tk)

    in_specs = [
        pl.BlockSpec((tm, tk), lambda i, j, k: (i, k)),
        pl.BlockSpec((tk, tn), lambda i, j, k: (k, j)),
    ]
    operands = [x, weight_t]

    if bias is not None:
        b = bias.astype(jnp.float32).reshape(1, N)
        if Np != N:
            b = jnp.pad(b, ((0, 0), (0, Np - N)))
        in_specs.append(pl.BlockSpec((1, tn), lambda i, j, k: (0, j)))
        operands.append(b)
        kernel = functools.partial(_nl_kernel_bias, activation=activation)
    else:
        kernel = functools.partial(_nl_kernel_nobias, activation=activation)

    # Explicit VMEM budget: double-buffered input/output tiles + f32 accumulator
    # with ~2x headroom, capped well under v7x's 64 MiB physical VMEM.
    in_bytes = jnp.dtype(x.dtype).itemsize
    out_bytes = jnp.dtype(out_dtype).itemsize
    need = (2 * (tm * tk + tk * tn) * in_bytes
            + 2 * tm * tn * out_bytes
            + tm * tn * 4
            + 2 * tn * 4)
    vmem_limit = int(min(max(2 * need, 32 * 1024 * 1024), 64 * 1024 * 1024))

    out_padded = pl.pallas_call(
        kernel,
        out_shape=jax.ShapeDtypeStruct((Mp, Np), out_dtype),
        grid_spec=pltpu.PrefetchScalarGridSpec(
            num_scalar_prefetch=0,
            grid=grid,
            in_specs=in_specs,
            out_specs=pl.BlockSpec((tm, tn), lambda i, j, k: (i, j)),
            scratch_shapes=[pltpu.VMEM((tm, tn), jnp.float32)],
        ),
        compiler_params=pltpu.CompilerParams(
            dimension_semantics=("parallel", "parallel", "arbitrary"),
            vmem_limit_bytes=vmem_limit,
        ),
    )(*operands)

    if (Mp, Np) != (M, N):
        out_padded = out_padded[:M, :N]
    return out_padded


def init_linear_params(key, input_size, output_size, bias=True):
    """torch.nn.Linear-style init (uniform +-1/sqrt(fan_in)), stored pre-transposed.

    Returns weight_t with shape [input_size, output_size] (== torch weight.T).
    """
    kw, kb = jax.random.split(key)
    bound = 1.0 / jnp.sqrt(jnp.float32(input_size))
    weight_t = jax.random.uniform(
        kw, (input_size, output_size), jnp.float32, minval=-bound, maxval=bound
    )
    b = (
        jax.random.uniform(kb, (output_size,), jnp.float32, minval=-bound, maxval=bound)
        if bias
        else None
    )
    return weight_t, b


if __name__ == "__main__":
    key = jax.random.PRNGKey(0)
    k_x, k_p, k_x2, k_p2 = jax.random.split(key, 4)

    # Small shapes consistent with the VAE MLP usage: batch=8, in=32, out=64.
    batch, input_size, output_size = 8, 32, 64
    x = jax.random.normal(k_x, (batch, input_size), jnp.float32)
    w_t, b = init_linear_params(k_p, input_size, output_size, bias=True)

    # Linear + tanh activation.
    out = jax.block_until_ready(nonlinear(x, w_t, b, activation="tanh"))
    ref = jnp.tanh(x @ w_t + b)
    assert out.shape == (batch, output_size)
    assert jnp.allclose(out, ref, atol=1e-5, rtol=1e-5), "tanh path mismatch"

    # No-activation, no-bias path (bias operand is dropped entirely).
    out_nb = jax.block_until_ready(nonlinear(x, w_t, None, activation=None))
    assert jnp.allclose(out_nb, x @ w_t, atol=1e-5, rtol=1e-5), "no-bias path mismatch"

    # Unaligned shapes exercising the padding + K-tiled accumulator path.
    M2, K2, N2 = 130, 200, 300
    x2 = jax.random.normal(k_x2, (M2, K2), jnp.float32)
    w_t2, b2 = init_linear_params(k_p2, K2, N2, bias=True)
    out2 = jax.block_until_ready(nonlinear(x2, w_t2, b2, activation="sigmoid"))
    ref2 = jax.nn.sigmoid(x2 @ w_t2 + b2)
    assert out2.shape == (M2, N2)
    # approx reciprocal in the sigmoid epilogue -> slightly looser tolerance.
    assert jnp.allclose(out2, ref2, atol=2e-3, rtol=2e-3), "sigmoid path mismatch"

    print("KERNEL_OK")
</pallas_src>

<mosaic_0001>
module attributes {stable_mosaic.version = 11 : i64} {
  func.func @_nl_kernel_bias(%arg0: i32, %arg1: i32, %arg2: i32, %arg3: memref<8x128xf32, #tpu.memory_space<vmem>>, %arg4: memref<128x128xf32, #tpu.memory_space<vmem>>, %arg5: memref<1x128xf32, #tpu.memory_space<vmem>>, %arg6: memref<8x128xf32, #tpu.memory_space<vmem>>, %arg7: memref<8x128xf32, #tpu.memory_space<vmem>>) attributes {dimension_semantics = [#tpu.dimension_semantics<parallel>, #tpu.dimension_semantics<parallel>, #tpu.dimension_semantics<arbitrary>], iteration_bounds = array<i64: 1, 1, 1>, scalar_prefetch = 0 : i64, scratch_operands = 1 : i64, tpu.core_type = #tpu.core_type<tc>, window_params = [{transform_indices = @transform_0, window_bounds = array<i64: 8, 128>}, {transform_indices = @transform_1, window_bounds = array<i64: 128, 128>}, {transform_indices = @transform_2, window_bounds = array<i64: 1, 128>}, {transform_indices = @transform_3, window_bounds = array<i64: 8, 128>}]} {
    %c0_i32 = arith.constant 0 : i32
    %0 = arith.cmpi eq, %arg2, %c0_i32 : i32
    %1 = arith.extui %0 : i1 to i32
    %c0_i32_0 = arith.constant 0 : i32
    %2 = arith.cmpi ne, %1, %c0_i32_0 : i32
    scf.if %2 {
      %cst_10 = arith.constant 0.000000e+00 : f32
      %12 = vector.broadcast %cst_10 : f32 to vector<8x128xf32>
      %c0_11 = arith.constant 0 : index
      %c0_12 = arith.constant 0 : index
      %13 = vector.load %arg7[%c0_11, %c0_12] : memref<8x128xf32, #tpu.memory_space<vmem>>, vector<8x128xf32>
      tpu.vector_store %arg7[%c0_11, %c0_12], %12 {strides = array<i32>} : memref<8x128xf32, #tpu.memory_space<vmem>>, vector<8x128xf32>,
    } else {
    }
    %c0 = arith.constant 0 : index
    %c0_1 = arith.constant 0 : index
    %3 = vector.load %arg7[%c0, %c0_1] : memref<8x128xf32, #tpu.memory_space<vmem>>, vector<8x128xf32>
    %c0_2 = arith.constant 0 : index
    %c0_3 = arith.constant 0 : index
    %4 = vector.load %arg3[%c0_2, %c0_3] : memref<8x128xf32, #tpu.memory_space<vmem>>, vector<8x128xf32>
    %c0_4 = arith.constant 0 : index
    %c0_5 = arith.constant 0 : index
    %5 = vector.load %arg4[%c0_4, %c0_5] : memref<128x128xf32, #tpu.memory_space<vmem>>, vector<128x128xf32>
    %cst = arith.constant dense<0.000000e+00> : vector<8x128xf32>
    %6 = tpu.matmul %4, %5, %cst {dimension_numbers = #tpu.dot_dimension_numbers<[1], [0], [0], [1], [0, 0, 1, 1], [], []>} : vector<8x128xf32>, vector<128x128xf32>, vector<8x128xf32> -> vector<8x128xf32>
    %7 = arith.addf %3, %6 : vector<8x128xf32>
    %c0_6 = arith.constant 0 : index
    %c0_7 = arith.constant 0 : index
    %8 = vector.load %arg7[%c0_6, %c0_7] : memref<8x128xf32, #tpu.memory_space<vmem>>, vector<8x128xf32>
    tpu.vector_store %arg7[%c0_6, %c0_7], %7 {strides = array<i32>} : memref<8x128xf32, #tpu.memory_space<vmem>>, vector<8x128xf32>,
    %c0_i32_8 = arith.constant 0 : i32
    %9 = arith.cmpi eq, %arg2, %c0_i32_8 : i32
    %10 = arith.extui %9 : i1 to i32
    %c0_i32_9 = arith.constant 0 : i32
    %11 = arith.cmpi ne, %10, %c0_i32_9 : i32
    scf.if %11 {
      %c0_10 = arith.constant 0 : index
      %c0_11 = arith.constant 0 : index
      %12 = vector.load %arg7[%c0_10, %c0_11] : memref<8x128xf32, #tpu.memory_space<vmem>>, vector<8x128xf32>
      %c0_12 = arith.constant 0 : index
      %c0_13 = arith.constant 0 : index
      %13 = vector.load %arg5[%c0_12, %c0_13] : memref<1x128xf32, #tpu.memory_space<vmem>>, vector<1x128xf32>
      %14 = vector.broadcast %13 : vector<1x128xf32> to vector<8x128xf32>
      %15 = arith.addf %12, %14 : vector<8x128xf32>
      %16 = math.tanh %15 : vector<8x128xf32>
      %c0_14 = arith.constant 0 : index
      %c0_15 = arith.constant 0 : index
      %17 = vector.load %arg6[%c0_14, %c0_15] : memref<8x128xf32, #tpu.memory_space<vmem>>, vector<8x128xf32>
      tpu.vector_store %arg6[%c0_14, %c0_15], %16 {strides = array<i32>} : memref<8x128xf32, #tpu.memory_space<vmem>>, vector<8x128xf32>,
    } else {
    }
    return
  }
  func.func @transform_0(%arg0: i32, %arg1: i32, %arg2: i32) -> (i32, i32) {
    %c0_i32 = arith.constant 0 : i32
    return %arg0, %arg2 : i32, i32
  }
  func.func @transform_1(%arg0: i32, %arg1: i32, %arg2: i32) -> (i32, i32) {
    %c0_i32 = arith.constant 0 : i32
    return %arg2, %arg1 : i32, i32
  }
  func.func @transform_2(%arg0: i32, %arg1: i32, %arg2: i32) -> (i32, i32) {
    %c0_i32 = arith.constant 0 : i32
    %c0_i32_0 = arith.constant 0 : i32
    return %c0_i32, %arg1 : i32, i32
  }
  func.func @transform_3(%arg0: i32, %arg1: i32, %arg2: i32) -> (i32, i32) {
    %c0_i32 = arith.constant 0 : i32
    return %arg0, %arg1 : i32, i32
  }
}

</mosaic_0001>

<bundles_post_ra>
// kernel: tpu_custom_call.1
= control target key start
LH: loop header
LB: loop body
LE: loop exit
PB: predicated region body
PF: predicated region fallthrough
CT: control target
= control target key end

     0   :  { %8 = vsyncpa [#allocation4], 0  ;;  %s333_s0 = inlined_call_operand.hbm [shape: f32[8,128], index: 0, kind: input, shape index: {}]   ;;  %s334_s1 = inlined_call_operand.hbm [shape: f32[128,128], index: 1, kind: input, shape index: {}]   ;;  %s335_s2 = inlined_call_operand.vmem [shape: f32[1,128], index: 2, kind: input, shape index: {}]   ;;  %s336_s3 = inlined_call_operand.hbm [shape: f32[8,128], index: 3, kind: output, shape index: {}]  }
   0x1   :  { %9 = vsyncpa [#allocation7], 0 }
   0x2   :  { %10 = vsyncpa [#allocation5], 0  ;;  %s294_s12 = smov [#allocation3]   ;;  %s295_s14 = smov [#allocation6]  }
   0x3   :  { %s17_s13 = sshll.u32 %s294_s12, 4  ;;  %s26_s15 = sshll.u32 %s295_s14, 4  ;;  %s18_s13 = int_to_ptr.vmem [resolvable:$true] %s17_s13  ;;  %s27_s15 = int_to_ptr.vmem [resolvable:$true] %s26_s15 }
   0x4   :  { %s236_s16 = scalar_lea.vmem %s18_s13, 128  ;;  %p241_p1 = scmp.lt.s32.totalorder %s18_s13, %s18_s13 }
   0x5   :  { %p237_p0 = scmp.ne.s32.totalorder %s18_s13, %s236_s16  ;;  %p242_p2 = scmp.lt.s32.totalorder %s236_s16, %s236_s16 }
   0x7   :  { %p243_p3 = por %p242_p2, %p241_p1 }
   0x9   :  { %p244_p4 = pnand %p243_p3, %p237_p0 }
   0xb   :  { %247 = shalt.err (!%p244_p4)
}
   0xc   :  { %20 = dma.hbm_to_vmem [thread:$0]  %s333_s0, 128, %s18_s13, [#allocation4]  }
   0xd   :  { %s256_s19 = scalar_lea.vmem %s27_s15, 2048  ;;  %p261_p6 = scmp.lt.s32.totalorder %s27_s15, %s27_s15 }
   0xe   :  { %p257_p5 = scmp.ne.s32.totalorder %s27_s15, %s256_s19  ;;  %p262_p7 = scmp.lt.s32.totalorder %s256_s19, %s256_s19 }
  0x10   :  { %p263_p8 = por %p262_p7, %p261_p6 }
  0x12   :  { %p264_p9 = pnand %p263_p8, %p257_p5 }
  0x14   :  { %267 = shalt.err (!%p264_p9)
}
  0x15   :  { %s296_s20 = smov 128   ;;  %s297_s21 = smov 8  }
  0x16   :  { %32 = dma.hbm_to_vmem [thread:$0]  %s334_s1, 2048, %s27_s15, [#allocation7], %s296_s20, %s296_s20, %s297_s21  }
  0x17   :  { %288 = dma.done.wait [#allocation4], 128  }
  0x18   :  { %289 = vsyncadd [#allocation4], 4294967168 }
  0x19   :  { %290 = dma.done.wait [#allocation7], 2048  }
  0x1a   :  { %291 = vsyncadd [#allocation7], 4294965248  ;;  %v298_v0 = vmov 0.0   ;;  %vm299_vm0 = vmmov 0   ;;  %v63_v1 = vld [vmem:[#allocation6 + $0x78] sm:$0xff]  ;;  %v62_v2 = vld [vmem:[#allocation6 + $0x70] sm:$0xff] }
  0x1b   :  { %184 = vmatprep.subr.mxu0 %v298_v0  ;;  %216 = vmatprep.mubr.msk.f32.mxu0 %vm299_vm0, %v298_v0  ;;  %v61_v3 = vld [vmem:[#allocation6 + $0x68] sm:$0xff]  ;;  %v60_v4 = vld [vmem:[#allocation6 + $0x60] sm:$0xff]  ;;  %v59_v5 = vld [vmem:[#allocation6 + $0x58] sm:$0xff]  ;;  %s300_s24 = smov [#allocation8]  }
  0x1c   :  { %185 = vmatpush3.msra.mxu0 %v63_v1  ;;  %v58_v6 = vld [vmem:[#allocation6 + $0x50] sm:$0xff]  ;;  %v57_v7 = vld [vmem:[#allocation6 + $0x48] sm:$0xff]  ;;  %v56_v8 = vld [vmem:[#allocation6 + $0x40] sm:$0xff]  ;;  %s156_s25 = sshll.u32 %s300_s24, 4  ;;  %s157_s25 = int_to_ptr.vmem [resolvable:$true] %s156_s25 }
  0x1d   :  { %186 = vmatprep.subr.mxu0 %v298_v0  ;;  %v55_v9 = vld [vmem:[#allocation6 + $0x38] sm:$0xff]  ;;  %v54_v10 = vld [vmem:[#allocation6 + $0x30] sm:$0xff]  ;;  %v53_v11 = vld [vmem:[#allocation6 + $0x28] sm:$0xff]  ;;  %s268_s26 = scalar_lea.vmem %s157_s25, 128  ;;  %p273_p11 = scmp.lt.s32.totalorder %s157_s25, %s157_s25 }
  0x1e   :  { %187 = vmatpush3.msra.mxu0 %v62_v2  ;;  %v52_v12 = vld [vmem:[#allocation6 + $0x20] sm:$0xff]  ;;  %v51_v13 = vld [vmem:[#allocation6 + $0x18] sm:$0xff]  ;;  %v50_v14 = vld [vmem:[#allocation6 + $0x10] sm:$0xff]  ;;  %p269_p10 = scmp.ne.s32.totalorder %s157_s25, %s268_s26  ;;  %p274_p12 = scmp.lt.s32.totalorder %s268_s26, %s268_s26 }
  0x1f   :  { %188 = vmatprep.subr.mxu0 %v298_v0  ;;  %v49_v15 = vld [vmem:[#allocation6 + $0x8] sm:$0xff]  ;;  %v48_v16 = vld [vmem:[#allocation6] sm:$0xff]  ;;  %v47_v17 = vld [vmem:[#allocation3] sm:$0xff] }
  0x20   :  { %189 = vmatpush3.msra.mxu0 %v61_v3  ;;  %v166_v18 = vld [vmem:[%s335_s2] ss:$0 sm:$0xff]  ;;  %p275_p13 = por %p274_p12, %p273_p11 }
  0x21   :  { %190 = vmatprep.subr.mxu0 %v298_v0 }
  0x22   :  { %191 = vmatpush3.msra.mxu0 %v60_v4  ;;  %p276_p0 = pnand %p275_p13, %p269_p10 }
  0x23   :  { %192 = vmatprep.subr.mxu0 %v298_v0 }
  0x24   :  { %193 = vmatpush3.msra.mxu0 %v59_v5 }
  0x25   :  { %194 = vmatprep.subr.mxu0 %v298_v0 }
  0x26   :  { %195 = vmatpush3.msra.mxu0 %v58_v6 }
  0x27   :  { %196 = vmatprep.subr.mxu0 %v298_v0 }
  0x28   :  { %197 = vmatpush3.msra.mxu0 %v57_v7 }
  0x29   :  { %198 = vmatprep.subr.mxu0 %v298_v0 }
  0x2a   :  { %199 = vmatpush3.msra.mxu0 %v56_v8 }
  0x2b   :  { %200 = vmatprep.subr.mxu0 %v298_v0 }
  0x2c   :  { %201 = vmatpush3.msra.mxu0 %v55_v9 }
  0x2d   :  { %202 = vmatprep.subr.mxu0 %v298_v0 }
  0x2e   :  { %203 = vmatpush3.msra.mxu0 %v54_v10 }
  0x2f   :  { %204 = vmatprep.subr.mxu0 %v298_v0 }
  0x30   :  { %205 = vmatpush3.msra.mxu0 %v53_v11 }
  0x31   :  { %206 = vmatprep.subr.mxu0 %v298_v0 }
  0x32   :  { %207 = vmatpush3.msra.mxu0 %v52_v12 }
  0x33   :  { %208 = vmatprep.subr.mxu0 %v298_v0 }
  0x34   :  { %209 = vmatpush3.msra.mxu0 %v51_v13 }
  0x35   :  { %210 = vmatprep.subr.mxu0 %v298_v0 }
  0x36   :  { %211 = vmatpush3.msra.mxu0 %v50_v14 }
  0x37   :  { %212 = vmatprep.subr.mxu0 %v298_v0 }
  0x38   :  { %213 = vmatpush3.msra.mxu0 %v49_v15 }
  0x39   :  { %214 = vmatprep.subr.mxu0 %v298_v0 }
  0x3a   :  { %215 = vmatpush3.msra.mxu0 %v48_v16 }
  0x3b   :  { %217 = vmatmul.mubr.f32.vlgmr.msra.gmra.mxu0 %v47_v17 }
  0xfb   :  { %v130_v19 = vpop.f32.mrf.mxu0 }
  0xfc   :  { %v147_v20 = vadd.f32 %v166_v18, %v130_v19 }
  0xfd   :  { %v218_v21 = vpop.f32.mrf.mxu0 }
  0xfe   :  { %226 = vtanh.f32 %v147_v20 }
 0x10b   :  { %v227_v22 = vpop.eup %226 }
 0x10c   :  { %149 = vst [vmem:[#allocation8] sm:$0xff] %v227_v22 }
 0x10d   :  { %279 = shalt.err (!%p276_p0)
}
 0x10e   :  { %159 = dma.vmem_to_hbm [thread:$0]  %s157_s25, 128, %s336_s3, [#allocation5]  }
 0x10f   :  { %292 = dma.done.wait [#allocation5], 128  }
 0x110   :  { %293 = vsyncadd [#allocation5], 4294967168 }
 0x111   :  { %163 = vsyncpa [#allocation4], 1 }
 0x112   :  { %164 = vsyncpa [#allocation7], 1 }
 0x113   :  { %165 = vsyncpa [#allocation5], 1 }

</bundles_post_ra>
